<compile_context>
chip_gen: v6e
topology: v6e:2x2x1
jax: 0.10.0
libtpu: 0.0.40
codegen_flags: <defaults>
</compile_context>

<pallas_src>
import functools

import jax
import jax.numpy as jnp
from jax.experimental import pallas as pl
from jax.experimental.pallas import tpu as pltpu


def _binary_kernel(op, compute_dtype, x_ref, y_ref, o_ref):
    x = x_ref[...].astype(compute_dtype)
    y = y_ref[...].astype(compute_dtype)
    o_ref[...] = op(x, y).astype(o_ref.dtype)


def _choose_lane(total):
    # Widest lane-dense last dim that divides the element count.
    for lane in (1024, 512, 256, 128):
        if total % lane == 0:
            return lane
    return 128


def _sublane_multiple(*dtypes):
    # 4-byte dtypes pack 8 rows per vreg, 2-byte 16, 1-byte 32.
    return max(32 // min(4, jnp.dtype(d).itemsize) for d in dtypes)


def binary_operation(x, y, operator, *, target_block_bytes=2 * 1024 * 1024):
    """Elementwise operator(x, y) via a tiled Pallas TPU kernel (torch semantics)."""
    x = jnp.asarray(x)
    y = jnp.asarray(y)

    # Abstract eval gives the true output shape/dtype (comparisons -> bool,
    # integer true_divide -> float, broadcasting).
    out_aval = jax.eval_shape(
        operator,
        jax.ShapeDtypeStruct(x.shape, x.dtype),
        jax.ShapeDtypeStruct(y.shape, y.dtype),
    )
    out_shape, out_dtype = out_aval.shape, out_aval.dtype

    # TODO(synk): broadcasting is handled by materializing broadcast copies; a
    # broadcast-aware BlockSpec would avoid the extra HBM traffic.
    if x.shape != out_shape:
        x = jnp.broadcast_to(x, out_shape)
    if y.shape != out_shape:
        y = jnp.broadcast_to(y, out_shape)

    compute_dtype = jnp.result_type(x.dtype, y.dtype)
    is_bool_out = jnp.dtype(out_dtype) == jnp.dtype(jnp.bool_)
    store_dtype = jnp.int8 if is_bool_out else out_dtype

    total = int(x.size)
    if total == 0:
        return jnp.zeros(out_shape, out_dtype)

    lane = _choose_lane(total)
    sub = _sublane_multiple(x.dtype, y.dtype, store_dtype)
    max_itemsize = max(
        jnp.dtype(d).itemsize for d in (x.dtype, y.dtype, store_dtype)
    )

    # Rare path: element count not a multiple of 128 -> pad a tiny tail with
    # ones (keeps div-like ops finite there); sliced off after the kernel.
    padded_total = pl.cdiv(total, lane) * lane
    needs_pad = padded_total != total

    x_flat = jnp.ravel(x)
    y_flat = jnp.ravel(y)
    if needs_pad:
        tail = padded_total - total
        x_flat = jnp.concatenate([x_flat, jnp.ones((tail,), x.dtype)])
        y_flat = jnp.concatenate([y_flat, jnp.ones((tail,), y.dtype)])

    rows = padded_total // lane
    x2d = x_flat.reshape(rows, lane)
    y2d = y_flat.reshape(rows, lane)

    slab_bytes = rows * lane * max_itemsize
    target_rows = max(sub, target_block_bytes // (lane * max_itemsize))

    if rows <= target_rows:
        if slab_bytes > (1 * 1024 * 1024) and rows >= 2 * sub:
            # Mid-sized slab: split in two so both v7x TensorCores stream.
            tile_rows = pl.cdiv(pl.cdiv(rows, 2), sub) * sub
        else:
            # Single block covering the whole slab (block == full array dims,
            # so no (8,128) divisibility requirement).
            tile_rows = rows
    else:
        tile_rows = max(sub, (min(target_rows, rows) // sub) * sub)

    grid_size = pl.cdiv(rows, tile_rows)

    bytes_accessed = total * (
        jnp.dtype(x.dtype).itemsize
        + jnp.dtype(y.dtype).itemsize
        + jnp.dtype(store_dtype).itemsize
    )
    cost = pl.CostEstimate(
        flops=total, transcendentals=0, bytes_accessed=bytes_accessed
    )

    kernel = functools.partial(_binary_kernel, operator, compute_dtype)

    out2d = pl.pallas_call(
        kernel,
        out_shape=jax.ShapeDtypeStruct((rows, lane), store_dtype),
        grid=(grid_size,),
        in_specs=[
            pl.BlockSpec((tile_rows, lane), lambda i: (i, 0)),
            pl.BlockSpec((tile_rows, lane), lambda i: (i, 0)),
        ],
        out_specs=pl.BlockSpec((tile_rows, lane), lambda i: (i, 0)),
        compiler_params=pltpu.CompilerParams(
            dimension_semantics=("parallel",)
        ),
        cost_estimate=cost,
    )(x2d, y2d)

    out_flat = out2d.reshape(-1)
    if needs_pad:
        out_flat = out_flat[:total]
    out = out_flat.reshape(out_shape)
    if is_bool_out:
        out = out.astype(jnp.bool_)
    return out


if __name__ == "__main__":
    key = jax.random.PRNGKey(0)
    kx, ky = jax.random.split(key)
    x = jax.random.normal(kx, (2, 4, 16, 16), dtype=jnp.float32)
    y = jax.random.normal(ky, (2, 4, 16, 16), dtype=jnp.float32)

    # The PyTorch module takes `operator` as a ctor arg (e.g. torch.add,
    # torch.mul, torch.gt); exercise representative elementwise operators.
    out_add = jax.block_until_ready(binary_operation(x, y, jnp.add))
    out_mul = jax.block_until_ready(binary_operation(x, y, jnp.multiply))
    out_gt = jax.block_until_ready(binary_operation(x, y, jnp.greater))

    assert jnp.allclose(out_add, x + y, atol=1e-6)
    assert jnp.allclose(out_mul, x * y, atol=1e-6)
    assert out_gt.dtype == jnp.bool_ and bool(jnp.all(out_gt == (x > y)))

    print("KERNEL_OK")
</pallas_src>

<mosaic_0001>
module attributes {stable_mosaic.version = 11 : i64} {
  func.func @_binary_kernel(%arg0: i32, %arg1: memref<2x1024xf32, #tpu.memory_space<vmem>>, %arg2: memref<2x1024xf32, #tpu.memory_space<vmem>>, %arg3: memref<2x1024xf32, #tpu.memory_space<vmem>>) attributes {dimension_semantics = [#tpu.dimension_semantics<parallel>], iteration_bounds = array<i64: 1>, scalar_prefetch = 0 : i64, scratch_operands = 0 : i64, tpu.core_type = #tpu.core_type<tc>, window_params = [{transform_indices = @transform_0, window_bounds = array<i64: 2, 1024>}, {transform_indices = @transform_1, window_bounds = array<i64: 2, 1024>}, {transform_indices = @transform_2, window_bounds = array<i64: 2, 1024>}]} {
    %c0 = arith.constant 0 : index
    %c0_0 = arith.constant 0 : index
    %0 = vector.load %arg1[%c0, %c0_0] : memref<2x1024xf32, #tpu.memory_space<vmem>>, vector<2x1024xf32>
    %c0_1 = arith.constant 0 : index
    %c0_2 = arith.constant 0 : index
    %1 = vector.load %arg2[%c0_1, %c0_2] : memref<2x1024xf32, #tpu.memory_space<vmem>>, vector<2x1024xf32>
    %2 = arith.addf %0, %1 : vector<2x1024xf32>
    %c0_3 = arith.constant 0 : index
    %c0_4 = arith.constant 0 : index
    %3 = vector.load %arg3[%c0_3, %c0_4] : memref<2x1024xf32, #tpu.memory_space<vmem>>, vector<2x1024xf32>
    tpu.vector_store %arg3[%c0_3, %c0_4], %2 {strides = array<i32>} : memref<2x1024xf32, #tpu.memory_space<vmem>>, vector<2x1024xf32>,
    return
  }
  func.func @transform_0(%arg0: i32) -> (i32, i32) {
    %c0_i32 = arith.constant 0 : i32
    %c0_i32_0 = arith.constant 0 : i32
    return %arg0, %c0_i32 : i32, i32
  }
  func.func @transform_1(%arg0: i32) -> (i32, i32) {
    %c0_i32 = arith.constant 0 : i32
    %c0_i32_0 = arith.constant 0 : i32
    return %arg0, %c0_i32 : i32, i32
  }
  func.func @transform_2(%arg0: i32) -> (i32, i32) {
    %c0_i32 = arith.constant 0 : i32
    %c0_i32_0 = arith.constant 0 : i32
    return %arg0, %c0_i32 : i32, i32
  }
}

</mosaic_0001>

<bundles_post_ra>
// kernel: tpu_custom_call.1
= control target key start
LH: loop header
LB: loop body
LE: loop exit
PB: predicated region body
PF: predicated region fallthrough
CT: control target
= control target key end

     0   :  { %7 = vsyncpa [#allocation3], 0  ;;  %s156_s0 = inlined_call_operand.hbm [shape: f32[2,1024], index: 0, kind: input, shape index: {}]   ;;  %s157_s1 = inlined_call_operand.hbm [shape: f32[2,1024], index: 1, kind: input, shape index: {}]   ;;  %s158_s2 = inlined_call_operand.hbm [shape: f32[2,1024], index: 2, kind: output, shape index: {}]  }
   0x1   :  { %8 = vsyncpa [#allocation6], 0 }
   0x2   :  { %9 = vsyncpa [#allocation4], 0  ;;  %s129_s9 = smov [#allocation2]   ;;  %s130_s11 = smov [#allocation5]  }
   0x3   :  { %s16_s10 = sshll.u32 %s129_s9, 4  ;;  %s26_s12 = sshll.u32 %s130_s11, 4  ;;  %s17_s10 = int_to_ptr.vmem [resolvable:$true] %s16_s10  ;;  %s27_s12 = int_to_ptr.vmem [resolvable:$true] %s26_s12 }
   0x4   :  { %s71_s13 = scalar_lea.vmem %s17_s10, 256  ;;  %p76_p1 = scmp.lt.s32.totalorder %s17_s10, %s17_s10 }
   0x5   :  { %p72_p0 = scmp.ne.s32.totalorder %s17_s10, %s71_s13  ;;  %p77_p2 = scmp.lt.s32.totalorder %s71_s13, %s71_s13 }
   0x7   :  { %p78_p3 = por %p77_p2, %p76_p1 }
   0x9   :  { %p79_p4 = pnand %p78_p3, %p72_p0 }
   0xb   :  { %82 = shalt.err (!%p79_p4)
}
   0xc   :  { %19 = dma.hbm_to_vmem [thread:$0]  %s156_s0, 256, %s17_s10, [#allocation3]  }
   0xd   :  { %s91_s16 = scalar_lea.vmem %s27_s12, 256  ;;  %p96_p6 = scmp.lt.s32.totalorder %s27_s12, %s27_s12 }
   0xe   :  { %p92_p5 = scmp.ne.s32.totalorder %s27_s12, %s91_s16  ;;  %p97_p7 = scmp.lt.s32.totalorder %s91_s16, %s91_s16 }
  0x10   :  { %p98_p8 = por %p97_p7, %p96_p6 }
  0x12   :  { %p99_p9 = pnand %p98_p8, %p92_p5 }
  0x14   :  { %102 = shalt.err (!%p99_p9)
}
  0x15   :  { %29 = dma.hbm_to_vmem [thread:$0]  %s157_s1, 256, %s27_s12, [#allocation6]  }
  0x16   :  { %123 = dma.done.wait [#allocation3], 256  }
  0x17   :  { %124 = vsyncadd [#allocation3], 4294967040 }
  0x18   :  { %125 = dma.done.wait [#allocation6], 256  }
  0x19   :  { %126 = vsyncadd [#allocation6], 4294967040  ;;  %s131_s19 = smov [#allocation7]   ;;  %v36_v0 = vld [vmem:[#allocation2] sm:$0xff]  ;;  %v38_v1 = vld [vmem:[#allocation5] sm:$0xff] }
  0x1a   :  { %s50_s20 = sshll.u32 %s131_s19, 4  ;;  %v37_v2 = vld [vmem:[#allocation2 + $0x8] sm:$0xff]  ;;  %v40_v3 = vadd.f32 %v38_v1, %v36_v0  ;;  %v39_v4 = vld [vmem:[#allocation5 + $0x8] sm:$0xff]  ;;  %s51_s20 = int_to_ptr.vmem [resolvable:$true] %s50_s20 }
  0x1b   :  { %v41_v5 = vadd.f32 %v39_v4, %v37_v2  ;;  %s103_s0 = scalar_lea.vmem %s51_s20, 256  ;;  %p108_p11 = scmp.lt.s32.totalorder %s51_s20, %s51_s20 }
  0x1c   :  { %42 = vst [vmem:[#allocation7] sm:$0xff] %v40_v3  ;;  %p104_p10 = scmp.ne.s32.totalorder %s51_s20, %s103_s0  ;;  %p109_p12 = scmp.lt.s32.totalorder %s103_s0, %s103_s0 }
  0x1d   :  { %43 = vst [vmem:[#allocation7 + $0x8] sm:$0xff] %v41_v5 }
  0x1e   :  { %p110_p13 = por %p109_p12, %p108_p11 }
  0x20   :  { %p111_p0 = pnand %p110_p13, %p104_p10 }
  0x22   :  { %114 = shalt.err (!%p111_p0)
}
  0x23   :  { %53 = dma.vmem_to_hbm [thread:$0]  %s51_s20, 256, %s158_s2, [#allocation4]  }
  0x24   :  { %127 = dma.done.wait [#allocation4], 256  }
  0x25   :  { %128 = vsyncadd [#allocation4], 4294967040 }
  0x26   :  { %57 = vsyncpa [#allocation3], 1 }
  0x27   :  { %58 = vsyncpa [#allocation6], 1 }
  0x28   :  { %59 = vsyncpa [#allocation4], 1 }

</bundles_post_ra>
